<compile_context>
chip_gen: v5e
topology: v5e:2x2
jax: 0.10.0
libtpu: 0.0.40
codegen_flags: <defaults>
</compile_context>

<pallas_src>
import functools

import jax
import jax.numpy as jnp
from jax.experimental import pallas as pl
from jax.experimental.pallas import tpu as pltpu


def _cnn1d_kernel(x_ref, w_ref, b_ref, o_ref, *, bf16_mxu_operands: bool):
    # x_ref : (tile_n, L*C_in)          VMEM, lane-dense
    # w_ref : (L*C_in, L_out*C_out)     VMEM, resident across the grid
    # b_ref : (1, L_out*C_out)          VMEM, f32
    # o_ref : (tile_n, L_out*C_out)     VMEM
    x = x_ref[...]
    w = w_ref[...]
    if bf16_mxu_operands:
        # Operand truncation only; accumulation stays f32 (relevant on v5e,
        # where f32 multi-pass MXU can otherwise become the bottleneck).
        x = x.astype(jnp.bfloat16)
        w = w.astype(jnp.bfloat16)
    acc = jnp.dot(x, w, preferred_element_type=jnp.float32)
    acc = acc + b_ref[...]
    o_ref[...] = acc.astype(o_ref.dtype)


def _round_up(v: int, m: int) -> int:
    return ((v + m - 1) // m) * m


def _tpu_generation():
    """Best-effort TPU generation string ('v4'..'v7') or None."""
    try:
        kind = jax.devices()[0].device_kind.lower()
    except Exception:
        return None
    for gen in ("v7", "v6", "v5", "v4"):
        if gen in kind:
            return gen
    return None


def _vmem_limit_bytes(generation) -> int:
    # v4/v5e/v6e: 128 MiB physical VMEM -> 64 MiB scoped limit is safe and lets
    # tiles grow.  v7x: only 64 MiB physical -> keep 48 MiB.  Unknown: 32 MiB.
    return {"v4": 64 << 20, "v5": 64 << 20, "v6": 64 << 20, "v7": 48 << 20}.get(
        generation, 32 << 20)


def _choose_tile_n(n: int, generation) -> int:
    """Row tile per grid step.

    Big tiles amortize the ~0.35us/grid-step overhead.  At tile_n=8192 the
    double-buffered in+out blocks are ~22 MiB (f32), under every generation's
    VMEM limit.  On v7x, medium/large N is split into >= 8 steps so both
    TensorCores get >= 4 steps each and double-buffering hides the first/last
    DMA; single-TC chips (v5e/v6e) keep the biggest tile instead.
    """
    n8 = _round_up(max(n, 8), 8)
    cap = 8192
    if generation == "v7" and n8 >= 4096:
        return min(cap, max(512, _round_up(pl.cdiv(n8, 8), 8)))
    return min(n8, cap)


@functools.partial(
    jax.jit, static_argnames=("kernel_size", "tile_n", "bf16_mxu_operands"))
def cnn1d_forward(x, weight, bias, *, kernel_size=2, tile_n=None,
                  bf16_mxu_operands=False):
    """Conv1d(C_in -> C_out, kernel_size, stride=1, padding=0) over the L axis.

    x      : (B, n_node, L, C_in)   channels-last (f32 or bf16; bf16 halves HBM)
    weight : (C_out, C_in, K)       torch Conv1d layout
    bias   : (C_out,)
    returns (B, n_node, L-K+1, C_out), same dtype as x.
    """
    B, n_node, L, c_in = x.shape
    c_out = weight.shape[0]
    k = kernel_size
    l_out = L - k + 1
    N = B * n_node

    generation = _tpu_generation()
    if tile_n is None:
        tile_n = _choose_tile_n(N, generation)
    else:
        tile_n = _round_up(max(int(tile_n), 8), 8)   # keep (8,128) lowering legal

    # ---- wrapper-side layout plumbing (views / tiny tensors, no heavy work) ----
    # rows = samples, lanes = folded (L, C_in) axis  (pure reshape, contiguous).
    # No padding: grid = cdiv(N, tile_n); Pallas masks the ragged last block.
    x2d = x.reshape(N, L * c_in)

    # Toeplitz / fully-unrolled-im2col weight: one matmul covers every tap.
    #   w_big[l*C_in + c, t*C_out + o] = weight[o, c, l - t]  if 0 <= l-t < K
    w_taps = jnp.transpose(weight, (2, 1, 0)).astype(x.dtype)       # (K, C_in, C_out)
    w_big = jnp.zeros((L, c_in, l_out, c_out), x.dtype)
    for t in range(l_out):                                          # small static loop
        w_big = w_big.at[t:t + k, :, t, :].set(w_taps)
    w_big = w_big.reshape(L * c_in, l_out * c_out)

    # bias_big[t*C_out + o] = bias[o]   (kept f32; added to the f32 accumulator)
    b_big = jnp.tile(bias.astype(jnp.float32), l_out).reshape(1, l_out * c_out)

    itemsize = jnp.dtype(x.dtype).itemsize
    cost = pl.CostEstimate(
        flops=2 * N * (L * c_in) * (l_out * c_out),
        bytes_accessed=(N * (L * c_in + l_out * c_out) + (L * c_in) * (l_out * c_out)) * itemsize,
        transcendentals=0,
    )

    grid = (pl.cdiv(N, tile_n),)
    out2d = pl.pallas_call(
        functools.partial(_cnn1d_kernel, bf16_mxu_operands=bf16_mxu_operands),
        out_shape=jax.ShapeDtypeStruct((N, l_out * c_out), x.dtype),
        grid=grid,
        in_specs=[
            pl.BlockSpec((tile_n, L * c_in), lambda i: (i, 0)),
            pl.BlockSpec((L * c_in, l_out * c_out), lambda i: (0, 0)),
            pl.BlockSpec((1, l_out * c_out), lambda i: (0, 0)),
        ],
        out_specs=pl.BlockSpec((tile_n, l_out * c_out), lambda i: (i, 0)),
        compiler_params=pltpu.CompilerParams(
            dimension_semantics=("parallel",),
            vmem_limit_bytes=_vmem_limit_bytes(generation),
        ),
        cost_estimate=cost,
    )(x2d, w_big, b_big)

    # out2d[n, t*C_out + o]  ->  (B, n_node, L_out, C_out)   (pure reshape)
    return out2d.reshape(B, n_node, l_out, c_out)


def _reference(x, weight, bias, kernel_size):
    """Pure-JAX reference matching torch.nn.Conv1d semantics."""
    B, n_node, L, c_in = x.shape
    c_out = weight.shape[0]
    l_out = L - kernel_size + 1
    xf = x.reshape(B * n_node, L, c_in)
    out = jnp.zeros((B * n_node, l_out, c_out), jnp.float32)
    for k in range(kernel_size):
        out += jnp.einsum("nlc,oc->nlo", xf[:, k:k + l_out, :],
                          weight[:, :, k].astype(jnp.float32))
    out += bias.astype(jnp.float32)[None, None, :]
    return out.reshape(B, n_node, l_out, c_out).astype(x.dtype)


if __name__ == "__main__":
    in_channels, out_channels, kernel_size = 16, 32, 2
    key = jax.random.PRNGKey(0)

    # cfg1: shapes consistent with the module (opt.batchSize, opt.n_node, opt.L).
    # cfg2: N not divisible by tile_n + multi-step grid (exercises the ragged
    #       last block -- no wrapper-side padding anymore).
    # cfg3: bf16 MXU-operand mode (v5e lever), f32 I/O, looser tolerance.
    # cfg4: bf16 I/O mode (halves HBM traffic), looser tolerance.
    configs = [
        dict(batch=2, n_node=4, L=8, tile_n=None, dtype=jnp.float32,
             bf16_ops=False, atol=1e-5, rtol=1e-5),
        dict(batch=3, n_node=5, L=8, tile_n=8, dtype=jnp.float32,
             bf16_ops=False, atol=1e-5, rtol=1e-5),
        dict(batch=4, n_node=16, L=8, tile_n=None, dtype=jnp.float32,
             bf16_ops=True, atol=2e-2, rtol=2e-2),
        dict(batch=4, n_node=16, L=8, tile_n=None, dtype=jnp.bfloat16,
             bf16_ops=False, atol=3e-2, rtol=3e-2),
    ]
    for cfg in configs:
        key, kx, kw, kb = jax.random.split(key, 4)
        x = jax.random.normal(
            kx, (cfg["batch"], cfg["n_node"], cfg["L"], in_channels),
            jnp.float32).astype(cfg["dtype"])
        weight = 0.02 * jax.random.normal(
            kw, (out_channels, in_channels, kernel_size), jnp.float32)
        bias = 0.01 * jax.random.normal(kb, (out_channels,), jnp.float32)

        out = cnn1d_forward(x, weight, bias, kernel_size=kernel_size,
                            tile_n=cfg["tile_n"],
                            bf16_mxu_operands=cfg["bf16_ops"])
        out = jax.block_until_ready(out)

        ref = _reference(x, weight, bias, kernel_size)
        l_out = cfg["L"] - kernel_size + 1
        assert out.shape == (cfg["batch"], cfg["n_node"], l_out, out_channels), out.shape
        assert out.dtype == x.dtype, out.dtype
        assert jnp.allclose(out.astype(jnp.float32), ref.astype(jnp.float32),
                            atol=cfg["atol"], rtol=cfg["rtol"]), "mismatch vs reference"

    print("KERNEL_OK")
</pallas_src>

<mosaic_0001>
module attributes {stable_mosaic.version = 11 : i64} {
  func.func @_cnn1d_kernel(%arg0: i32, %arg1: memref<8x128xf32, #tpu.memory_space<vmem>>, %arg2: memref<128x224xf32, #tpu.memory_space<vmem>>, %arg3: memref<1x224xf32, #tpu.memory_space<vmem>>, %arg4: memref<8x224xf32, #tpu.memory_space<vmem>>) attributes {dimension_semantics = [#tpu.dimension_semantics<parallel>], iteration_bounds = array<i64: 1>, scalar_prefetch = 0 : i64, scratch_operands = 0 : i64, tpu.core_type = #tpu.core_type<tc>, window_params = [{transform_indices = @transform_0, window_bounds = array<i64: 8, 128>}, {pipeline_mode = #tpu.pipeline_mode<synchronous>, transform_indices = @transform_1, window_bounds = array<i64: 128, 224>}, {pipeline_mode = #tpu.pipeline_mode<synchronous>, transform_indices = @transform_2, window_bounds = array<i64: 1, 224>}, {transform_indices = @transform_3, window_bounds = array<i64: 8, 224>}]} {
    %c0 = arith.constant 0 : index
    %c0_0 = arith.constant 0 : index
    %0 = vector.load %arg1[%c0, %c0_0] : memref<8x128xf32, #tpu.memory_space<vmem>>, vector<8x128xf32>
    %c0_1 = arith.constant 0 : index
    %c0_2 = arith.constant 0 : index
    %1 = vector.load %arg2[%c0_1, %c0_2] : memref<128x224xf32, #tpu.memory_space<vmem>>, vector<128x224xf32>
    %cst = arith.constant dense<0.000000e+00> : vector<8x224xf32>
    %2 = tpu.matmul %0, %1, %cst {dimension_numbers = #tpu.dot_dimension_numbers<[1], [0], [0], [1], [0, 0, 1, 1], [], []>} : vector<8x128xf32>, vector<128x224xf32>, vector<8x224xf32> -> vector<8x224xf32>
    %c0_3 = arith.constant 0 : index
    %c0_4 = arith.constant 0 : index
    %3 = vector.load %arg3[%c0_3, %c0_4] : memref<1x224xf32, #tpu.memory_space<vmem>>, vector<1x224xf32>
    %4 = vector.broadcast %3 : vector<1x224xf32> to vector<8x224xf32>
    %5 = arith.addf %2, %4 : vector<8x224xf32>
    %c0_5 = arith.constant 0 : index
    %c0_6 = arith.constant 0 : index
    %6 = vector.load %arg4[%c0_5, %c0_6] : memref<8x224xf32, #tpu.memory_space<vmem>>, vector<8x224xf32>
    tpu.vector_store %arg4[%c0_5, %c0_6], %5 {strides = array<i32>} : memref<8x224xf32, #tpu.memory_space<vmem>>, vector<8x224xf32>,
    return
  }
  func.func @transform_0(%arg0: i32) -> (i32, i32) {
    %c0_i32 = arith.constant 0 : i32
    %c0_i32_0 = arith.constant 0 : i32
    return %arg0, %c0_i32 : i32, i32
  }
  func.func @transform_1(%arg0: i32) -> (i32, i32) {
    %c0_i32 = arith.constant 0 : i32
    %c0_i32_0 = arith.constant 0 : i32
    %c0_i32_1 = arith.constant 0 : i32
    return %c0_i32, %c0_i32_0 : i32, i32
  }
  func.func @transform_2(%arg0: i32) -> (i32, i32) {
    %c0_i32 = arith.constant 0 : i32
    %c0_i32_0 = arith.constant 0 : i32
    %c0_i32_1 = arith.constant 0 : i32
    return %c0_i32, %c0_i32_0 : i32, i32
  }
  func.func @transform_3(%arg0: i32) -> (i32, i32) {
    %c0_i32 = arith.constant 0 : i32
    %c0_i32_0 = arith.constant 0 : i32
    return %arg0, %c0_i32 : i32, i32
  }
}

</mosaic_0001>

<bundles_post_ra>
// kernel: tile.8
= control target key start
LH: loop header
LB: loop body
LE: loop exit
PB: predicated region body
PF: predicated region fallthrough
CT: control target
= control target key end

     0   :  { %s22_s0 = inlined_call_operand.vmem [shape: f32[32], index: 0, kind: input, shape index: {}]   ;;  %s23_s1 = inlined_call_operand.vmem [shape: f32[7,32], index: 1, kind: output, shape index: {}]  }
   0x1   :  { %v4_v0 = vld [vmem:[%s22_s0] ss:$0 sm:$0xff] }
   0x2   :  { %5 = vst [vmem:[%s23_s1] sm:$0xff] %v4_v0 }

// kernel: tile.9
= control target key start
LH: loop header
LB: loop body
LE: loop exit
PB: predicated region body
PF: predicated region fallthrough
CT: control target
= control target key end

     0   :  { %s45_s8 = smov 96   ;;  %s20_s9 = smov 3  ;;  %vm4_vm0 = vcmask 261120   ;;  %vm10_vm1 = vcmask 1048320   ;;  %vm17_vm2 = vcmask 785920   ;;  %vm24_vm3 = vcmask 523520   ;;  %s76_s0 = inlined_call_operand.vmem [shape: f32[7,32], index: 0, kind: input, shape index: {}]   ;;  %s77_s1 = inlined_call_operand.vmem [shape: f32[1,224], index: 1, kind: output, shape index: {}]  }
   0x1   :  { %v38_v0 = vld [vmem:[%s76_s0 + $0x3] sm:$0x1]   ;;  %v40_v1 = vld [vmem:[%s76_s0 + $0x1] ss:$4 sm:%s20_s9]   ;;  %s13_s12 = smov 3  ;;  %s46_s13 = smov 32  }
   0x2   :  { %8 = vrot.lane.b32.xlu0 %v38_v0, %s45_s8  ;;  %22 = vrot.lane.b32.xlu1 %v40_v1, %s46_s13  ;;  %v39_v2 = vld [vmem:[%s76_s0 + $0x2] ss:$4 sm:%s13_s12]   ;;  %s47_s16 = smov 64   ;;  %s2_s17 = smov 3 }
   0x3   :  { %v3_v3 = vld [vmem:[%s76_s0] ss:$4 sm:%s2_s17]  }
   0x4   :  { %5 = vst.msk [vmem:[#allocation0] ss:$8 sm:$0x3] %vm4_vm0, %v3_v3  }
   0xa   :  { %15 = vrot.lane.b32.xlu0 %v39_v2, %s47_s16 }
  0x74   :  { %v9_v4 = vpop.permute.xlu0 %8   ;;  %v23_v5 = vpop.permute.xlu1 %22  }
  0x75   :  { %11 = vst.msk [vmem:[#allocation0] sm:$0x1] %vm10_vm1, %v9_v4  }
  0x7c   :  { %v16_v6 = vpop.permute.xlu0 %15  }
  0x7d   :  { %18 = vst.msk [vmem:[#allocation0] ss:$8 sm:$0x3] %vm17_vm2, %v16_v6  }
  0x7e   :  { %25 = vst.msk [vmem:[#allocation0] ss:$8 sm:$0x3] %vm24_vm3, %v23_v5  }
  0x85   :  { %v28_v7 = vld [vmem:[#allocation0] sm:$0x1]  ;;  %v33_v8 = vld [vmem:[#allocation0 + $0x8] sm:$0x1] }
  0x86   :  { %31 = vst [vmem:[%s77_s1] sm:$0x1] %v28_v7 }
  0x87   :  { %41 = vst [vmem:[%s77_s1 + $0x1] sm:$0x1] %v33_v8 }

// kernel: cnn1d_forward.1
= control target key start
LH: loop header
LB: loop body
LE: loop exit
PB: predicated region body
PF: predicated region fallthrough
CT: control target
= control target key end

     0   :  { %vm94_vm0 = vcmask 785408   ;;  %s228_s1 = inlined_call_operand.vmem [shape: f32[128,224], index: 1, kind: input, shape index: {}]   ;;  %s229_s0 = inlined_call_operand.vmem [shape: f32[8,128], index: 0, kind: input, shape index: {}]   ;;  %s230_s2 = inlined_call_operand.vmem [shape: f32[1,224], index: 2, kind: input, shape index: {}]   ;;  %s231_s3 = inlined_call_operand.vmem [shape: f32[8,224], index: 3, kind: output, shape index: {}]  }
   0x1   :  { %v45_v0 = vld [vmem:[%s228_s1 + $0xf0] sm:$0xff]  ;;  %v46_v1 = vld [vmem:[%s228_s1 + $0xf8] sm:$0xff]  ;;  %v43_v2 = vld [vmem:[%s228_s1 + $0xe0] sm:$0xff] }
   0x2   :  { %53 = vmatpush.msra.mxu0 %v45_v0  ;;  %73 = vmatpush.msra.mxu1 %v46_v1  ;;  %v44_v3 = vld [vmem:[%s228_s1 + $0xe8] sm:$0xff]  ;;  %v41_v4 = vld [vmem:[%s228_s1 + $0xd0] sm:$0xff]  ;;  %v42_v5 = vld [vmem:[%s228_s1 + $0xd8] sm:$0xff] }
   0x3   :  { %v39_v6 = vld [vmem:[%s228_s1 + $0xc0] sm:$0xff]  ;;  %v40_v7 = vld [vmem:[%s228_s1 + $0xc8] sm:$0xff]  ;;  %v37_v8 = vld [vmem:[%s228_s1 + $0xb0] sm:$0xff] }
   0x4   :  { %54 = vmatpush.msra.mxu0 %v43_v2  ;;  %74 = vmatpush.msra.mxu1 %v44_v3  ;;  %v38_v9 = vld [vmem:[%s228_s1 + $0xb8] sm:$0xff]  ;;  %v35_v10 = vld [vmem:[%s228_s1 + $0xa0] sm:$0xff]  ;;  %v36_v11 = vld [vmem:[%s228_s1 + $0xa8] sm:$0xff] }
   0x5   :  { %v33_v12 = vld [vmem:[%s228_s1 + $0x90] sm:$0xff]  ;;  %v34_v13 = vld [vmem:[%s228_s1 + $0x98] sm:$0xff]  ;;  %v31_v14 = vld [vmem:[%s228_s1 + $0x80] sm:$0xff] }
   0x6   :  { %55 = vmatpush.msra.mxu0 %v41_v4  ;;  %75 = vmatpush.msra.mxu1 %v42_v5  ;;  %v32_v15 = vld [vmem:[%s228_s1 + $0x88] sm:$0xff]  ;;  %v29_v16 = vld [vmem:[%s228_s1 + $0x70] sm:$0xff]  ;;  %v30_v17 = vld [vmem:[%s228_s1 + $0x78] sm:$0xff] }
   0x7   :  { %v27_v18 = vld [vmem:[%s228_s1 + $0x60] sm:$0xff]  ;;  %v28_v19 = vld [vmem:[%s228_s1 + $0x68] sm:$0xff]  ;;  %v25_v20 = vld [vmem:[%s228_s1 + $0x50] sm:$0xff] }
   0x8   :  { %56 = vmatpush.msra.mxu0 %v39_v6  ;;  %76 = vmatpush.msra.mxu1 %v40_v7  ;;  %v26_v21 = vld [vmem:[%s228_s1 + $0x58] sm:$0xff]  ;;  %v23_v22 = vld [vmem:[%s228_s1 + $0x40] sm:$0xff]  ;;  %v24_v23 = vld [vmem:[%s228_s1 + $0x48] sm:$0xff] }
   0x9   :  { %v21_v24 = vld [vmem:[%s228_s1 + $0x30] sm:$0xff]  ;;  %v22_v25 = vld [vmem:[%s228_s1 + $0x38] sm:$0xff]  ;;  %v19_v26 = vld [vmem:[%s228_s1 + $0x20] sm:$0xff] }
   0xa   :  { %57 = vmatpush.msra.mxu0 %v37_v8  ;;  %77 = vmatpush.msra.mxu1 %v38_v9  ;;  %v20_v27 = vld [vmem:[%s228_s1 + $0x28] sm:$0xff]  ;;  %v17_v28 = vld [vmem:[%s228_s1 + $0x10] sm:$0xff]  ;;  %v18_v29 = vld [vmem:[%s228_s1 + $0x18] sm:$0xff] }
   0xb   :  { %v15_v30 = vld [vmem:[%s228_s1] sm:$0xff]  ;;  %v16_v31 = vld [vmem:[%s228_s1 + $0x8] sm:$0xff] }
   0xc   :  { %58 = vmatpush.msra.mxu0 %v35_v10  ;;  %78 = vmatpush.msra.mxu1 %v36_v11  ;;  %v14_v32 = vld [vmem:[%s229_s0] sm:$0xff] }
   0xd   :  { %v47_v33 = vld [vmem:[%s230_s2] sm:$0x3] }
   0xe   :  { %59 = vmatpush.msra.mxu0 %v33_v12  ;;  %79 = vmatpush.msra.mxu1 %v34_v13  ;;  %v49_v34 = vperm.slane %v47_v33, 0  ;;  %v50_v35 = vperm.slane %v47_v33, 1 }
  0x10   :  { %60 = vmatpush.msra.mxu0 %v31_v14  ;;  %80 = vmatpush.msra.mxu1 %v32_v15 }
  0x12   :  { %61 = vmatpush.msra.mxu0 %v29_v16  ;;  %81 = vmatpush.msra.mxu1 %v30_v17 }
  0x14   :  { %62 = vmatpush.msra.mxu0 %v27_v18  ;;  %82 = vmatpush.msra.mxu1 %v28_v19 }
  0x16   :  { %63 = vmatpush.msra.mxu0 %v25_v20  ;;  %83 = vmatpush.msra.mxu1 %v26_v21 }
  0x18   :  { %64 = vmatpush.msra.mxu0 %v23_v22  ;;  %84 = vmatpush.msra.mxu1 %v24_v23 }
  0x1a   :  { %65 = vmatpush.msra.mxu0 %v21_v24  ;;  %85 = vmatpush.msra.mxu1 %v22_v25 }
  0x1c   :  { %66 = vmatpush.msra.mxu0 %v19_v26  ;;  %86 = vmatpush.msra.mxu1 %v20_v27 }
  0x1e   :  { %67 = vmatpush.msra.mxu0 %v17_v28  ;;  %87 = vmatpush.msra.mxu1 %v18_v29 }
  0x20   :  { %68 = vmatpush.msra.mxu0 %v15_v30  ;;  %88 = vmatpush.msra.mxu1 %v16_v31 }
  0x21   :  { %69 = vmatmul.f32.vlgmr.msra.gmra.mxu0 %v14_v32  ;;  %89 = vmatmul.f32.vlgmr.msra.gmra.mxu1 %v14_v32 }
  0x9e   :  { %v70_v36 = vpop.f32.mrf.mxu0  ;;  %v90_v37 = vpop.f32.mrf.mxu1 }
  0x9f   :  { %v71_v38 = vadd.f32 %v70_v36, %v49_v34  ;;  %v91_v39 = vadd.f32 %v90_v37, %v50_v35 }
  0xa1   :  { %93 = vst [vmem:[%s231_s3] sm:$0xff] %v71_v38 }
  0xa2   :  { %95 = vst.msk [vmem:[%s231_s3 + $0x8] sm:$0xff] %vm94_vm0, %v91_v39 }

</bundles_post_ra>
